<compile_context>
chip_gen: v5e
topology: v5e:2x2
jax: 0.10.0
libtpu: 0.0.40
codegen_flags: <defaults>
</compile_context>

<pallas_src>
import functools
import math

import jax
import jax.numpy as jnp
from jax.experimental import pallas as pl
from jax.experimental.pallas import tpu as pltpu


def _round_up(x, m):
    return (x + m - 1) // m * m


def conv_stack_kernel(layer_meta, base, slab_rows, lens_ref, x_ref, *args):
    """Whole ConvLayer stack (all enc_layers) for one batch element.

    layer_meta: static tuple of (Kmax, pad_l_max) per encoder layer.
    base      : 8-aligned slab row where the L valid activation rows start.
    slab_rows : total rows of the padded-slab scratch.
    lens_ref  : (B,) int32 SMEM scalar-prefetch ref (sequence lengths).
    x_ref     : (1, L, Cin0) bf16 input block.
    args      : per layer one (Kmax, Cin_l, hidden_pad) bf16 combined-weight
                ref and one (1, hidden_pad) f32 bias ref; then the
                (1, L, hidden_pad) output ref; then the (slab_rows, Cin_max)
                bf16 padded-slab scratch.
    """
    o_ref, xp_ref = args[-2], args[-1]
    refs = args[:-2]
    L = o_ref.shape[1]
    cin_max = xp_ref.shape[1]

    length = lens_ref[pl.program_id(0)]
    row_valid = jax.lax.broadcasted_iota(jnp.int32, (L, 1), 0) < length

    # Zero the conv padding rows once; they are never overwritten afterwards,
    # so every layer / tap reads true zeros there (no jnp.pad / concat).
    if base > 0:
        xp_ref[0:base, :] = jnp.zeros((base, cin_max), jnp.bfloat16)
    if slab_rows > base + L:
        xp_ref[base + L:slab_rows, :] = jnp.zeros(
            (slab_rows - base - L, cin_max), jnp.bfloat16)

    # Activations stay f32 and VMEM/vreg-resident across all layers.
    h = x_ref[0].astype(jnp.float32)                        # (L, Cin0)

    for li, (kmax, pad_l_max) in enumerate(layer_meta):     # static unroll
        w_ref = refs[2 * li]                                # (Kmax, Cin, Hpad) bf16
        b_ref = refs[2 * li + 1]                            # (1, Hpad) f32
        cin = w_ref.shape[1]

        # x.masked_fill_(~mask, 0) + a single f32->bf16 cast per layer, stored
        # once into the shared padded slab (sublane-aligned store at `base`).
        hm = jnp.where(row_valid, h, 0.0).astype(jnp.bfloat16)
        xp_ref[base:base + L, 0:cin] = hm

        # One full-hidden-width MXU matmul per absolute tap offset.  Branch
        # weights were merged host-side into lane-dense (Cin, hidden_pad)
        # matrices, so there is no branch concat and no narrow-Cout matmul.
        start = base - pad_l_max
        acc = jnp.dot(xp_ref[start:start + L, 0:cin], w_ref[0],
                      preferred_element_type=jnp.float32)
        for p in range(1, kmax):
            acc = acc + jnp.dot(xp_ref[start + p:start + p + L, 0:cin],
                                w_ref[p],
                                preferred_element_type=jnp.float32)

        h = jnp.maximum(acc + b_ref[...], 0.0)              # bias + ReLU in f32

    # TODO(synk): dropout omitted (f.dropout is identity in eval mode).
    o_ref[0] = h.astype(o_ref.dtype)                        # single lane-dense store


def _split_out_channels(out_channels, n):
    return [out_channels // n + (i < out_channels % n) for i in range(n)]


def _build_layer(branches, cin_store, hidden_pad):
    """Merge all kernel-size branches of one Conv1d layer into one tap-major
    combined weight (Kmax, cin_store, hidden_pad) + (1, hidden_pad) bias."""
    pads = [((w.shape[0] - 1) // 2, w.shape[0] // 2) for (w, _) in branches]
    pad_l_max = max(p for (p, _) in pads)
    pad_r_max = max(r for (_, r) in pads)
    kmax = pad_l_max + pad_r_max + 1
    cin = branches[0][0].shape[1]
    w_all = jnp.zeros((kmax, cin_store, hidden_pad), jnp.float32)
    b_all = jnp.zeros((1, hidden_pad), jnp.float32)
    col = 0
    for (w, b), (pad_l, _) in zip(branches, pads):
        K, _, cout = w.shape
        off = pad_l_max - pad_l          # even K drops the first output position
        w_all = w_all.at[off:off + K, :cin, col:col + cout].set(w)
        b_all = b_all.at[0, col:col + cout].set(b)
        col += cout
    return w_all.astype(jnp.bfloat16), b_all, (kmax, pad_l_max, pad_r_max)


def conv_layer_forward(params, x, mask):
    """x: (B, L, input_size) f32, mask: (B, L, 1) bool -> (B, L, hidden) f32."""
    B, L, cin0 = x.shape
    hidden = sum(w.shape[2] for (w, _) in params[-1])
    # Lane-dense output / intermediate width (unmasked vst, no relayout).
    hidden_pad = _round_up(hidden, 128)

    # Dense mask stream -> scalar-prefetched sequence lengths in SMEM.
    # TODO(synk): assumes `mask` is a contiguous-prefix padding mask (how
    # ConvLayer is used upstream); arbitrary masks would need the dense mask.
    lengths = jnp.sum(mask.astype(jnp.int32), axis=(1, 2)).astype(jnp.int32)

    layer_meta = []
    flat_inputs = []
    in_specs = [pl.BlockSpec((1, L, cin0), lambda b, lens: (b, 0, 0))]
    pad_l_global = 0
    pad_r_global = 0
    for li, branches in enumerate(params):
        cin_store = cin0 if li == 0 else hidden_pad
        w_all, b_all, (kmax, pad_l_max, pad_r_max) = _build_layer(
            branches, cin_store, hidden_pad)
        layer_meta.append((kmax, pad_l_max))
        pad_l_global = max(pad_l_global, pad_l_max)
        pad_r_global = max(pad_r_global, pad_r_max)
        flat_inputs.extend([w_all, b_all])
        # Grid-invariant weights/biases: whole-array VMEM residency
        # (single copy, no per-step double buffering).
        in_specs.append(pl.BlockSpec(memory_space=pltpu.MemorySpace.VMEM))
        in_specs.append(pl.BlockSpec(memory_space=pltpu.MemorySpace.VMEM))

    base = _round_up(max(pad_l_global, 0), 8)     # aligned interior store offset
    slab_rows = _round_up(base + L + pad_r_global, 8)
    cin_max = max(cin0, hidden_pad)

    kernel = functools.partial(conv_stack_kernel, tuple(layer_meta), base,
                               slab_rows)

    out_dtype = x.dtype   # TODO(synk): emit bf16 if the downstream consumer permits.

    # Explicit scoped-VMEM budget: single-copy weights + slab scratch +
    # double-buffered x/out blocks + a few live f32 (L, hidden_pad) slabs.
    est = (sum(int(a.size) * a.dtype.itemsize for a in flat_inputs)
           + slab_rows * cin_max * 2
           + 2 * L * cin0 * 2
           + 2 * L * hidden_pad * jnp.dtype(out_dtype).itemsize
           + 6 * L * max(hidden_pad, cin_max) * 4)
    vmem_limit = int(min(max(2 * est, 32 << 20), 96 << 20))

    # TODO(synk): for production L / hidden on v7x (64 MiB VMEM, 2 TCs, B==1)
    # add a parallel L-tile grid axis with an enc_layers*(Kmax-1) halo instead
    # of whole-L slabs (and deepen x buffering once the grid has enough steps).
    out = pl.pallas_call(
        kernel,
        out_shape=jax.ShapeDtypeStruct((B, L, hidden_pad), out_dtype),
        grid_spec=pltpu.PrefetchScalarGridSpec(
            num_scalar_prefetch=1,
            grid=(B,),
            in_specs=in_specs,
            out_specs=pl.BlockSpec((1, L, hidden_pad),
                                   lambda b, lens: (b, 0, 0)),
            scratch_shapes=[pltpu.VMEM((slab_rows, cin_max), jnp.bfloat16)],
        ),
        compiler_params=pltpu.CompilerParams(
            dimension_semantics=("parallel",),
            vmem_limit_bytes=vmem_limit),
    )(lengths, x.astype(jnp.bfloat16), *flat_inputs)

    return out[..., :hidden]


def init_conv_layer_params(key, input_size, hidden_size, kernel_sizes,
                           enc_layers, activation_coeff=2.0):
    """Deterministic synthetic params matching the module's __init__ shapes."""
    params = []
    for layer in range(enc_layers):
        in_c = input_size if layer == 0 else hidden_size
        branches = []
        for ks, out_c in zip(kernel_sizes,
                             _split_out_channels(hidden_size, len(kernel_sizes))):
            key, wk = jax.random.split(key)
            std = math.sqrt(1.0 / (in_c * ks) * activation_coeff)
            # nn.utils.weight_norm: at init g == ||v|| so effective weight == v.
            # TODO(synk): trained checkpoints would need explicit g * v/||v||.
            # Stored tap-major (K, Cin, Cout) == torch (Cout, Cin, K) transposed.
            w = std * jax.random.normal(wk, (ks, in_c, out_c), jnp.float32)
            b = jnp.zeros((out_c,), jnp.float32)
            branches.append((w, b))
        params.append(branches)
    return params


def _bf16_round_trip(a):
    return a.astype(jnp.bfloat16).astype(jnp.float32)


def conv_layer_reference(params, x, mask):
    """Pure-JAX per-branch reference mirroring the kernel's bf16 quantization.

    Built independently of the combined-weight assembly so it cross-checks the
    padding / even-K-drop / branch-concat semantics."""
    maskf = mask.astype(jnp.float32)
    B, L, _ = x.shape
    h = x.astype(jnp.float32)
    for branches in params:
        hm = _bf16_round_trip(h * maskf)
        outs = []
        for (w, bias) in branches:
            K, _, cout = w.shape
            wq = _bf16_round_trip(w)
            pad_l, pad_r = (K - 1) // 2, K // 2
            xp = jnp.pad(hm, ((0, 0), (pad_l, pad_r), (0, 0)))
            acc = jnp.zeros((B, L, cout), jnp.float32)
            for k in range(K):
                acc = acc + jnp.einsum("blc,cd->bld", xp[:, k:k + L, :], wq[k])
            outs.append(acc + bias)
        h = jnp.maximum(jnp.concatenate(outs, axis=-1), 0.0)
    return h


if __name__ == "__main__":
    B, L = 2, 16
    input_size, hidden_size = 8, 32
    kernel_sizes = [3, 2]     # one odd, one even (exercises the even-k drop path)
    enc_layers = 2

    key = jax.random.PRNGKey(0)
    kx, kp = jax.random.split(key)
    x = jax.random.normal(kx, (B, L, input_size), jnp.float32)
    seq_lens = jnp.array([16, 11])
    mask = (jnp.arange(L)[None, :] < seq_lens[:, None])[:, :, None]  # (B, L, 1) bool

    params = init_conv_layer_params(kp, input_size, hidden_size,
                                    kernel_sizes, enc_layers)

    out = conv_layer_forward(params, x, mask)
    out = jax.block_until_ready(out)
    assert out.shape == (B, L, hidden_size), out.shape
    assert bool(jnp.all(jnp.isfinite(out)))

    ref = conv_layer_reference(params, x, mask)
    err = float(jnp.max(jnp.abs(out - ref)))
    assert err < 1e-2, f"max abs err vs reference: {err}"
    print("KERNEL_OK")
</pallas_src>

<mosaic_0001>
module attributes {stable_mosaic.version = 11 : i64} {
  func.func @conv_stack_kernel(%arg0: i32, %arg1: memref<2xi32, #tpu.memory_space<smem>>, %arg2: memref<1x16x8xbf16, #tpu.memory_space<vmem>>, %arg3: memref<3x8x128xbf16, #tpu.memory_space<vmem>>, %arg4: memref<1x128xf32, #tpu.memory_space<vmem>>, %arg5: memref<3x128x128xbf16, #tpu.memory_space<vmem>>, %arg6: memref<1x128xf32, #tpu.memory_space<vmem>>, %arg7: memref<1x16x128xf32, #tpu.memory_space<vmem>>, %arg8: memref<32x128xbf16, #tpu.memory_space<vmem>>) attributes {dimension_semantics = [#tpu.dimension_semantics<parallel>], iteration_bounds = array<i64: 2>, scalar_prefetch = 1 : i64, scratch_operands = 1 : i64, tpu.core_type = #tpu.core_type<tc>, window_params = [{transform_indices = @transform_0, window_bounds = array<i64: 1, 16, 8>}, {pipeline_mode = #tpu.pipeline_mode<synchronous>, transform_indices = @transform_1, window_bounds = array<i64: 3, 8, 128>}, {pipeline_mode = #tpu.pipeline_mode<synchronous>, transform_indices = @transform_2, window_bounds = array<i64: 1, 128>}, {pipeline_mode = #tpu.pipeline_mode<synchronous>, transform_indices = @transform_3, window_bounds = array<i64: 3, 128, 128>}, {pipeline_mode = #tpu.pipeline_mode<synchronous>, transform_indices = @transform_4, window_bounds = array<i64: 1, 128>}, {transform_indices = @transform_5, window_bounds = array<i64: 1, 16, 128>}]} {
    %0 = arith.index_cast %arg0 : i32 to index
    %1 = memref.load %arg1[%0] : memref<2xi32, #tpu.memory_space<smem>>
    %2 = tpu.iota {dimensions = array<i32: 0>} : vector<16x1xi32>
    %3 = vector.broadcast %1 : i32 to vector<16x1xi32>
    %4 = arith.cmpi slt, %2, %3 : vector<16x1xi32>
    %cst = arith.constant 0.000000e+00 : bf16
    %5 = vector.broadcast %cst : bf16 to vector<8x128xbf16>
    %c0 = arith.constant 0 : index
    %c0_0 = arith.constant 0 : index
    %6 = vector.load %arg8[%c0, %c0_0] : memref<32x128xbf16, #tpu.memory_space<vmem>>, vector<8x128xbf16>
    tpu.vector_store %arg8[%c0, %c0_0], %5 {strides = array<i32>} : memref<32x128xbf16, #tpu.memory_space<vmem>>, vector<8x128xbf16>,
    %cst_1 = arith.constant 0.000000e+00 : bf16
    %7 = vector.broadcast %cst_1 : bf16 to vector<8x128xbf16>
    %c24 = arith.constant 24 : index
    %c0_2 = arith.constant 0 : index
    %8 = vector.load %arg8[%c24, %c0_2] : memref<32x128xbf16, #tpu.memory_space<vmem>>, vector<8x128xbf16>
    tpu.vector_store %arg8[%c24, %c0_2], %7 {strides = array<i32>} : memref<32x128xbf16, #tpu.memory_space<vmem>>, vector<8x128xbf16>,
    %c0_3 = arith.constant 0 : index
    %c0_4 = arith.constant 0 : index
    %c0_5 = arith.constant 0 : index
    %9 = vector.load %arg2[%c0_3, %c0_4, %c0_5] : memref<1x16x8xbf16, #tpu.memory_space<vmem>>, vector<1x16x8xbf16>
    %10 = vector.shape_cast %9 : vector<1x16x8xbf16> to vector<16x8xbf16>
    %11 = arith.extf %10 : vector<16x8xbf16> to vector<16x8xf32>
    %cst_6 = arith.constant 0.000000e+00 : f32
    %12 = vector.shape_cast %4 : vector<16x1xi1> to vector<16x1xi1>
    %13 = vector.broadcast %12 : vector<16x1xi1> to vector<16x8xi1>
    %14 = vector.broadcast %cst_6 : f32 to vector<16x8xf32>
    %15 = arith.select %13, %11, %14 : vector<16x8xi1>, vector<16x8xf32>
    %16 = arith.truncf %15 : vector<16x8xf32> to vector<16x8xbf16>
    %c8 = arith.constant 8 : index
    %c0_7 = arith.constant 0 : index
    %17 = vector.load %arg8[%c8, %c0_7] : memref<32x128xbf16, #tpu.memory_space<vmem>>, vector<16x8xbf16>
    tpu.vector_store %arg8[%c8, %c0_7], %16 {strides = array<i32>} : memref<32x128xbf16, #tpu.memory_space<vmem>>, vector<16x8xbf16>,
    %c7 = arith.constant 7 : index
    %c0_8 = arith.constant 0 : index
    %18 = vector.load %arg8[%c7, %c0_8] : memref<32x128xbf16, #tpu.memory_space<vmem>>, vector<16x8xbf16>
    %c0_9 = arith.constant 0 : index
    %c0_10 = arith.constant 0 : index
    %c0_11 = arith.constant 0 : index
    %19 = vector.load %arg3[%c0_9, %c0_10, %c0_11] : memref<3x8x128xbf16, #tpu.memory_space<vmem>>, vector<1x8x128xbf16>
    %20 = vector.shape_cast %19 : vector<1x8x128xbf16> to vector<8x128xbf16>
    %cst_12 = arith.constant dense<0.000000e+00> : vector<16x128xf32>
    %21 = tpu.matmul %18, %20, %cst_12 {dimension_numbers = #tpu.dot_dimension_numbers<[1], [0], [0], [1], [0, 0, 1, 1], [], []>} : vector<16x8xbf16>, vector<8x128xbf16>, vector<16x128xf32> -> vector<16x128xf32>
    %c8_13 = arith.constant 8 : index
    %c0_14 = arith.constant 0 : index
    %22 = vector.load %arg8[%c8_13, %c0_14] : memref<32x128xbf16, #tpu.memory_space<vmem>>, vector<16x8xbf16>
    %c1 = arith.constant 1 : index
    %c0_15 = arith.constant 0 : index
    %c0_16 = arith.constant 0 : index
    %23 = vector.load %arg3[%c1, %c0_15, %c0_16] : memref<3x8x128xbf16, #tpu.memory_space<vmem>>, vector<1x8x128xbf16>
    %24 = vector.shape_cast %23 : vector<1x8x128xbf16> to vector<8x128xbf16>
    %cst_17 = arith.constant dense<0.000000e+00> : vector<16x128xf32>
    %25 = tpu.matmul %22, %24, %cst_17 {dimension_numbers = #tpu.dot_dimension_numbers<[1], [0], [0], [1], [0, 0, 1, 1], [], []>} : vector<16x8xbf16>, vector<8x128xbf16>, vector<16x128xf32> -> vector<16x128xf32>
    %26 = arith.addf %21, %25 : vector<16x128xf32>
    %c9 = arith.constant 9 : index
    %c0_18 = arith.constant 0 : index
    %27 = vector.load %arg8[%c9, %c0_18] : memref<32x128xbf16, #tpu.memory_space<vmem>>, vector<16x8xbf16>
    %c2 = arith.constant 2 : index
    %c0_19 = arith.constant 0 : index
    %c0_20 = arith.constant 0 : index
    %28 = vector.load %arg3[%c2, %c0_19, %c0_20] : memref<3x8x128xbf16, #tpu.memory_space<vmem>>, vector<1x8x128xbf16>
    %29 = vector.shape_cast %28 : vector<1x8x128xbf16> to vector<8x128xbf16>
    %cst_21 = arith.constant dense<0.000000e+00> : vector<16x128xf32>
    %30 = tpu.matmul %27, %29, %cst_21 {dimension_numbers = #tpu.dot_dimension_numbers<[1], [0], [0], [1], [0, 0, 1, 1], [], []>} : vector<16x8xbf16>, vector<8x128xbf16>, vector<16x128xf32> -> vector<16x128xf32>
    %31 = arith.addf %26, %30 : vector<16x128xf32>
    %c0_22 = arith.constant 0 : index
    %c0_23 = arith.constant 0 : index
    %32 = vector.load %arg4[%c0_22, %c0_23] : memref<1x128xf32, #tpu.memory_space<vmem>>, vector<1x128xf32>
    %33 = vector.broadcast %32 : vector<1x128xf32> to vector<16x128xf32>
    %34 = arith.addf %31, %33 : vector<16x128xf32>
    %cst_24 = arith.constant 0.000000e+00 : f32
    %35 = vector.broadcast %cst_24 : f32 to vector<16x128xf32>
    %36 = arith.maximumf %34, %35 : vector<16x128xf32>
    %cst_25 = arith.constant 0.000000e+00 : f32
    %37 = vector.shape_cast %4 : vector<16x1xi1> to vector<16x1xi1>
    %38 = vector.broadcast %37 : vector<16x1xi1> to vector<16x128xi1>
    %39 = vector.broadcast %cst_25 : f32 to vector<16x128xf32>
    %40 = arith.select %38, %36, %39 : vector<16x128xi1>, vector<16x128xf32>
    %41 = arith.truncf %40 : vector<16x128xf32> to vector<16x128xbf16>
    %c8_26 = arith.constant 8 : index
    %c0_27 = arith.constant 0 : index
    %42 = vector.load %arg8[%c8_26, %c0_27] : memref<32x128xbf16, #tpu.memory_space<vmem>>, vector<16x128xbf16>
    tpu.vector_store %arg8[%c8_26, %c0_27], %41 {strides = array<i32>} : memref<32x128xbf16, #tpu.memory_space<vmem>>, vector<16x128xbf16>,
    %c7_28 = arith.constant 7 : index
    %c0_29 = arith.constant 0 : index
    %43 = vector.load %arg8[%c7_28, %c0_29] : memref<32x128xbf16, #tpu.memory_space<vmem>>, vector<16x128xbf16>
    %c0_30 = arith.constant 0 : index
    %c0_31 = arith.constant 0 : index
    %c0_32 = arith.constant 0 : index
    %44 = vector.load %arg5[%c0_30, %c0_31, %c0_32] : memref<3x128x128xbf16, #tpu.memory_space<vmem>>, vector<1x128x128xbf16>
    %45 = vector.shape_cast %44 : vector<1x128x128xbf16> to vector<128x128xbf16>
    %cst_33 = arith.constant dense<0.000000e+00> : vector<16x128xf32>
    %46 = tpu.matmul %43, %45, %cst_33 {dimension_numbers = #tpu.dot_dimension_numbers<[1], [0], [0], [1], [0, 0, 1, 1], [], []>} : vector<16x128xbf16>, vector<128x128xbf16>, vector<16x128xf32> -> vector<16x128xf32>
    %c8_34 = arith.constant 8 : index
    %c0_35 = arith.constant 0 : index
    %47 = vector.load %arg8[%c8_34, %c0_35] : memref<32x128xbf16, #tpu.memory_space<vmem>>, vector<16x128xbf16>
    %c1_36 = arith.constant 1 : index
    %c0_37 = arith.constant 0 : index
    %c0_38 = arith.constant 0 : index
    %48 = vector.load %arg5[%c1_36, %c0_37, %c0_38] : memref<3x128x128xbf16, #tpu.memory_space<vmem>>, vector<1x128x128xbf16>
    %49 = vector.shape_cast %48 : vector<1x128x128xbf16> to vector<128x128xbf16>
    %cst_39 = arith.constant dense<0.000000e+00> : vector<16x128xf32>
    %50 = tpu.matmul %47, %49, %cst_39 {dimension_numbers = #tpu.dot_dimension_numbers<[1], [0], [0], [1], [0, 0, 1, 1], [], []>} : vector<16x128xbf16>, vector<128x128xbf16>, vector<16x128xf32> -> vector<16x128xf32>
    %51 = arith.addf %46, %50 : vector<16x128xf32>
    %c9_40 = arith.constant 9 : index
    %c0_41 = arith.constant 0 : index
    %52 = vector.load %arg8[%c9_40, %c0_41] : memref<32x128xbf16, #tpu.memory_space<vmem>>, vector<16x128xbf16>
    %c2_42 = arith.constant 2 : index
    %c0_43 = arith.constant 0 : index
    %c0_44 = arith.constant 0 : index
    %53 = vector.load %arg5[%c2_42, %c0_43, %c0_44] : memref<3x128x128xbf16, #tpu.memory_space<vmem>>, vector<1x128x128xbf16>
    %54 = vector.shape_cast %53 : vector<1x128x128xbf16> to vector<128x128xbf16>
    %cst_45 = arith.constant dense<0.000000e+00> : vector<16x128xf32>
    %55 = tpu.matmul %52, %54, %cst_45 {dimension_numbers = #tpu.dot_dimension_numbers<[1], [0], [0], [1], [0, 0, 1, 1], [], []>} : vector<16x128xbf16>, vector<128x128xbf16>, vector<16x128xf32> -> vector<16x128xf32>
    %56 = arith.addf %51, %55 : vector<16x128xf32>
    %c0_46 = arith.constant 0 : index
    %c0_47 = arith.constant 0 : index
    %57 = vector.load %arg6[%c0_46, %c0_47] : memref<1x128xf32, #tpu.memory_space<vmem>>, vector<1x128xf32>
    %58 = vector.broadcast %57 : vector<1x128xf32> to vector<16x128xf32>
    %59 = arith.addf %56, %58 : vector<16x128xf32>
    %cst_48 = arith.constant 0.000000e+00 : f32
    %60 = vector.broadcast %cst_48 : f32 to vector<16x128xf32>
    %61 = arith.maximumf %59, %60 : vector<16x128xf32>
    %c0_49 = arith.constant 0 : index
    %c0_50 = arith.constant 0 : index
    %c0_51 = arith.constant 0 : index
    %62 = vector.load %arg7[%c0_49, %c0_50, %c0_51] : memref<1x16x128xf32, #tpu.memory_space<vmem>>, vector<1x16x128xf32>
    %63 = vector.shape_cast %62 : vector<1x16x128xf32> to vector<16x128xf32>
    %64 = vector.shape_cast %61 : vector<16x128xf32> to vector<1x16x128xf32>
    tpu.vector_store %arg7[%c0_49, %c0_50, %c0_51], %64 {strides = array<i32>} : memref<1x16x128xf32, #tpu.memory_space<vmem>>, vector<1x16x128xf32>,
    return
  }
  func.func @transform_0(%arg0: i32, %arg1: memref<2xi32, #tpu.memory_space<smem>>) -> (i32, i32, i32) {
    %c0_i32 = arith.constant 0 : i32
    %c0_i32_0 = arith.constant 0 : i32
    %c0_i32_1 = arith.constant 0 : i32
    return %arg0, %c0_i32, %c0_i32_0 : i32, i32, i32
  }
  func.func @transform_1(%arg0: i32, %arg1: memref<2xi32, #tpu.memory_space<smem>>) -> (i32, i32, i32) {
    %c0_i32 = arith.constant 0 : i32
    %c0_i32_0 = arith.constant 0 : i32
    %c0_i32_1 = arith.constant 0 : i32
    %c0_i32_2 = arith.constant 0 : i32
    return %c0_i32, %c0_i32_0, %c0_i32_1 : i32, i32, i32
  }
  func.func @transform_2(%arg0: i32, %arg1: memref<2xi32, #tpu.memory_space<smem>>) -> (i32, i32) {
    %c0_i32 = arith.constant 0 : i32
    %c0_i32_0 = arith.constant 0 : i32
    %c0_i32_1 = arith.constant 0 : i32
    return %c0_i32, %c0_i32_0 : i32, i32
  }
  func.func @transform_3(%arg0: i32, %arg1: memref<2xi32, #tpu.memory_space<smem>>) -> (i32, i32, i32) {
    %c0_i32 = arith.constant 0 : i32
    %c0_i32_0 = arith.constant 0 : i32
    %c0_i32_1 = arith.constant 0 : i32
    %c0_i32_2 = arith.constant 0 : i32
    return %c0_i32, %c0_i32_0, %c0_i32_1 : i32, i32, i32
  }
  func.func @transform_4(%arg0: i32, %arg1: memref<2xi32, #tpu.memory_space<smem>>) -> (i32, i32) {
    %c0_i32 = arith.constant 0 : i32
    %c0_i32_0 = arith.constant 0 : i32
    %c0_i32_1 = arith.constant 0 : i32
    return %c0_i32, %c0_i32_0 : i32, i32
  }
  func.func @transform_5(%arg0: i32, %arg1: memref<2xi32, #tpu.memory_space<smem>>) -> (i32, i32, i32) {
    %c0_i32 = arith.constant 0 : i32
    %c0_i32_0 = arith.constant 0 : i32
    %c0_i32_1 = arith.constant 0 : i32
    return %arg0, %c0_i32, %c0_i32_0 : i32, i32, i32
  }
}

</mosaic_0001>

<bundles_post_ra>
// kernel: tpu_custom_call.1
= control target key start
LH: loop header
LB: loop body
LE: loop exit
PB: predicated region body
PF: predicated region fallthrough
CT: control target
= control target key end

     0   :  { %s1139_s24 = smov [#allocation4]   ;;  %s1318_s0 = inlined_call_operand.vmem [shape: s32[2], index: 0, kind: input, shape index: {}]   ;;  %s1319_s1 = inlined_call_operand.vmem [shape: bf16[2,16,8], index: 1, kind: input, shape index: {}]   ;;  %s1320_s2 = inlined_call_operand.vmem [shape: bf16[3,8,128], index: 2, kind: input, shape index: {}]   ;;  %s1321_s3 = inlined_call_operand.vmem [shape: f32[1,128], index: 3, kind: input, shape index: {}]   ;;  %s1322_s4 = inlined_call_operand.hbm [shape: bf16[3,128,128], index: 4, kind: input, shape index: {}]   ;;  %s1323_s5 = inlined_call_operand.vmem [shape: f32[1,128], index: 5, kind: input, shape index: {}]   ;;  %s1324_s6 = inlined_call_operand.hbm [shape: f32[2,16,128], index: 6, kind: output, shape index: {}]  }
   0x1   :  { %s12_s23 = sshll.u32 %s1318_s0, 4  ;;  %s13_s23 = int_to_ptr.vmem [resolvable:$true] %s12_s23 }
   0x2   :  { %15 = dma.vmem_to_smem %s13_s23, 16, %s1139_s24, [#allocation3] }
   0x3   :  { %1111 = dma.done.wait [#allocation3], 16 }
   0x4   :  { %1112 = vsyncadd [#allocation3], 4294967280 }
   0x5   :  { %18 = sfence }
   0x6   :  { %19 = vsyncpa [#allocation6], 0 }
   0x7   :  { %20 = vsyncpa [#allocation7], 0 }
   0x8   :  { %22 = vsyncpa [#allocation7 + $0x1], 0  ;;  %s1184_s25 = smov 0   ;;  %s1186_s26 = smov 0  }
   0x9   :  { %s1188_s27 = smov 0   ;;  %s1190_s28 = smov 0  }
   0xa LB: > { %s1205_s0 = sadd.s32 4294967295, %s1137_s28   ;;  %s804_s29 = sadd.s32 4294967294, %s1137_s28   ;;  %s1137_s28 = sphi %s1190_s28, %s1334_s28   ;;  %s1133_s27 = sphi %s1188_s27, %s1333_s27   ;;  %s1129_s26 = sphi %s1186_s26, %s1332_s26   ;;  %s1125_s25 = sphi %s1184_s25, %s1331_s25  }
   0xb   : > { %s1209_s30 = sadd.s32 1, %s1137_s28   ;;  %s145_s7 = sadd.s32 1, %s1133_s27 }
   0xc   : > { %s142_s8 = ssub.s32 %s1137_s28, %s1209_s30  ;;  %p155_p0 = scmp.ne.s32.totalorder %s1133_s27, %s1129_s26 }
   0xd   : > { %p143_p1 = scmp.eq.s32.totalorder %s142_s8, 0  ;;  %p156_p2 = scmp.eq.s32.totalorder %s1205_s0, 1 }
   0xe   : > { %p161_p3 = scmp.ne.s32.totalorder %s1129_s26, %s1125_s25  ;;  %p162_p4 = scmp.eq.s32.totalorder %s804_s29, 1 }
   0xf   : > { %s1220_s9 = scalar_select %p143_p1, %s1133_s27, %s145_s7  }
  0x10   : > { %p1222_p5 = por %p156_p2, %p155_p0  ;;  %p1226_p6 = por %p162_p4, %p161_p3 }
  0x11   : > { %p805_p7 = scmp.ge.s32.totalorder %s1137_s28, 1  ;;  %p169_p8 = scmp.lt.s32.totalorder %s1137_s28, 3 }
  0x12   : > { %p973_p9 = scmp.eq.s32.totalorder %s1205_s0, 0  ;;  %s186_s14 = sshll.u32 %s1322_s4, 4  ;;  %s187_s14 = int_to_ptr.hbm [resolvable:$true] %s186_s14 }
  0x13   : > { %p170_p10 = pnand %p805_p7, %p169_p8  ;;  %s1140_s15 = smov [#allocation5]  }
  0x14   : > { %s188_s16 = sshll.u32 %s1140_s15, 4  ;;  %s1141_s17 = smov 64   ;;  %s189_s16 = int_to_ptr.vmem [resolvable:$true] %s188_s16 }
  0x15   : > { %p965_p11 = pneg %p170_p10  ;;  %s1142_s18 = smov 4  }
  0x16   : > { %215 = sbr.rel (%p170_p10) target bundleno = 379 (0x17b), region = 40 }
  0x17   : > { %p966_p12 = pnand %p973_p9, %p965_p11 }
  0x19   : > { %968 = dma.hbm_to_vmem [thread:$0]  (!%p966_p12), %s187_s14, 3072, %s189_s16, [#allocation6], %s1141_s17, %s1141_s17, %s1142_s18  }
  0x1b   : > { %1114 = dma.done.wait (%p973_p9), [#allocation6], 3072  }
  0x1c   : > { %1116 = vsyncadd (%p973_p9), [#allocation6], 4294964224  ;;  %p244_p13 = scmp.lt.s32.totalorder %s1205_s0, 1  ;;  %v251_v0 = vlaneseq  ;;  %s250_s19 = sld [smem:[#allocation4 + %s1205_s0]]  ;;  %v1143_v1 = vmov 0   ;;  %vm289_vm0 = vcmask 1043456  }
  0x1d   : > { %257 = vst [vmem:[#allocation2] sm:$0xf] %v1143_v1  ;;  %v813_v4 = vld [vmem:[%s1320_s2 + $0x4] sm:$0xf]  ;;  %v816_v7 = vld [vmem:[%s1320_s2 + $0x8] sm:$0xf] }
  0x1e   : > { %s245_s20 = scalar_select %p244_p13, %s1205_s0, 1  ;;  %v252_v2 = vshrl.u32 %v251_v0, 7  ;;  %258 = vst [vmem:[#allocation2 + $0xc] sm:$0xf] %v1143_v1  ;;  %v291_v8 = vsel %vm289_vm0, %v813_v4, 0  ;;  %v379_v14 = vsel %vm289_vm0, %v816_v7, 0 }
  0x1f   : > { %v277_v12 = vld [vmem:[%s1320_s2] sm:$0xf]  ;;  %300 = vmatpush.bf16.msra.mxu2 %v291_v8  ;;  %vm271_vm3 = vcmask 60416   ;;  %vm285_vm4 = vcmask 64512   ;;  %vm311_vm5 = vsmask.f32 4352 }
  0x20   : > { %s927_s21 = sshll.u32 %s245_s20, 3  ;;  %v253_v3 = vadd.s32 8, %v252_v2  ;;  %v333_v15 = vsel %vm289_vm0, %v277_v12, 0  ;;  %vm362_vm6 = vsmask.f32 7424  ;;  %v944_v48 = vld [vmem:[#allocation5 + $0x78] sm:$0xff] }
  0x21   : > { %s248_s24 = scalar_lea.vmem %s1319_s1, %s927_s21  ;;  %342 = vmatpush.bf16.msra.mxu1 %v333_v15  ;;  %501 = vmatpush.bf16.msra.mxu3 %v944_v48  ;;  %v943_v49 = vld [vmem:[#allocation5 + $0x70] sm:$0xff]  ;;  %v953_v50 = vld [vmem:[#allocation5 + $0xb8] sm:$0xff]  ;;  %v942_v52 = vld [vmem:[#allocation5 + $0x68] sm:$0xff]  ;;  %s241_s17 = sand.u32 1, %s1129_s26  }
  0x22   : > { %v254_v5 = vstv %s250_s19  ;;  %v956_v6 = vld [vmem:[%s248_s24] sm:$0xff]   ;;  %v936_v51 = vld [vmem:[#allocation5 + $0x38] sm:$0xff]  ;;  %v941_v55 = vld [vmem:[#allocation5 + $0x60] sm:$0xff]  ;;  %s810_s20 = sshll.u32 %s241_s17, 4  ;;  %s954_s21 = sshll.u32 %s1205_s0, 4 }
  0x23   : > { %vm1254_vm1 = vcmp.lt.s32.totalorder %v252_v2, %v254_v5  ;;  %vm1258_vm2 = vcmp.lt.s32.totalorder %v253_v3, %v254_v5  ;;  %v957_v11 = vunpack.c.l.bf16 %v956_v6  ;;  %v958_v13 = vunpack.c.h.bf16 %v956_v6  ;;  %388 = vmatpush.bf16.msrb.mxu2 %v379_v14  ;;  %v952_v53 = vld [vmem:[#allocation5 + $0xb0] sm:$0xff]  ;;  %585 = vmatpush.bf16.msra.mxu0 %v936_v51  ;;  %v951_v56 = vld [vmem:[#allocation5 + $0xa8] sm:$0xff]  ;;  %v940_v58 = vld [vmem:[#allocation5 + $0x58] sm:$0xff]  ;;  %s726_s24 = scalar_lea.hbm %s1324_s6, %s954_s21  ;;  %s243_s29 = scalar_lea.vmem [#allocation8], %s810_s20 }
  0x24   : > { %v1019_v20 = vld [vmem:[#allocation2] sm:$0x8]  ;;  %v934_v57 = vld [vmem:[#allocation5 + $0x28] sm:$0xff]  ;;  %v950_v59 = vld [vmem:[#allocation5 + $0xa0] sm:$0xff]  ;;  %s727_s7 = sshll.u32 %s243_s29, 4  ;;  %s729_s8 = sshll.u32 %s726_s24, 4  ;;  %s728_s7 = int_to_ptr.vmem [resolvable:$true] %s727_s7  ;;  %s730_s8 = int_to_ptr.hbm [resolvable:$true] %s729_s8 }
  0x25   : > { %v267_v16 = vsel %vm1254_vm1, %v957_v11, 0.0  ;;  %v268_v17 = vsel %vm1258_vm2, %v958_v13, 0.0  ;;  %v351_v21 = vld [vmem:[#allocation2 + $0xc] sm:$0x1]  ;;  %502 = vmatpush.bf16.msra.mxu3 %v943_v49  ;;  %688 = vmatpush.bf16.msrb.mxu1 %v953_v50  ;;  %v935_v54 = vld [vmem:[#allocation5 + $0x30] sm:$0xff]  ;;  %v933_v61 = vld [vmem:[#allocation5 + $0x20] sm:$0xff] }
  0x26   : > { %v269_v18 = vpack.c.bf16 %v267_v16, %v267_v16  ;;  %v270_v19 = vpack.c.bf16 %v268_v17, %v268_v17  ;;  %v359_v26 = vunpack.c.l.b16 %v351_v21  ;;  %v939_v62 = vld [vmem:[#allocation5 + $0x50] sm:$0xff]  ;;  %v949_v63 = vld [vmem:[#allocation5 + $0x98] sm:$0xff]  ;;  %v938_v1 = vld [vmem:[#allocation5 + $0x48] sm:$0xff]  ;;  %s715_s0 = scalar_lea.sflag [#allocation7], %s241_s17  ;;  %s1081_s12 = sshra.s32 %s730_s8, 4  ;;  %s1082_s12 = int_to_ptr.hbm [resolvable:$true] %s1081_s12 }
  0x27   : > { %586 = vmatpush.bf16.msra.mxu0 %v935_v54  ;;  %v932_v0 = vld [vmem:[#allocation5 + $0x18] sm:$0xff]  ;;  %v948_v2 = vld [vmem:[#allocation5 + $0x90] sm:$0xff]  ;;  %v937_v4 = vld [vmem:[#allocation5 + $0x40] sm:$0xff]  ;;  %s1083_s13 = scalar_lea.hbm %s1082_s12, 16  ;;  %s1087_s16 = scalar_lea.hbm %s1324_s6, 32 }
  0x28   : > { %272 = vst.msk [vmem:[#allocation2 + $0x4] sm:$0xf] %vm271_vm3, %v269_v18  ;;  %v361_v33 = vpack.c.b16 %v359_v26, %v359_v26  ;;  %v931_v3 = vld [vmem:[#allocation5 + $0x10] sm:$0xff]  ;;  %v947_v5 = vld [vmem:[#allocation5 + $0x88] sm:$0xff]  ;;  %v946_v11 = vld [vmem:[#allocation5 + $0x80] sm:$0xff]  ;;  %p1084_p0 = scmp.ne.s32.totalorder %s1082_s12, %s1083_s13  ;;  %p1088_p3 = scmp.lt.s32.totalorder %s1082_s12, %s1324_s6 }
  0x29   : > { %273 = vst.msk [vmem:[#allocation2 + $0x8] sm:$0xf] %vm271_vm3, %v270_v19  ;;  %503 = vmatpush.bf16.msra.mxu3 %v942_v52  ;;  %689 = vmatpush.bf16.msrb.mxu1 %v952_v53  ;;  %v930_v8 = vld [vmem:[#allocation5 + $0x8] sm:$0xff]  ;;  %v929_v12 = vld [vmem:[#allocation5] sm:$0xff]  ;;  %v1015_v14 = vld [vmem:[%s1321_s3] ss:$0 sm:$0xff]  ;;  %p1089_p4 = scmp.lt.s32.totalorder %s1087_s16, %s1083_s13 }
  0x2a   : > { %v371_v43 = vshll.u32 %v361_v33, 16  ;;  %p1085_p1 = pnand %p1084_p0, %p1222_p5 }
  0x2b   : > { %587 = vmatpush.bf16.msra.mxu0 %v934_v57  ;;  %p1090_p7 = por %p1089_p4, %p1088_p3 }
  0x2c   : > { %v373_v46 = vrot.slane %v371_v43, 1  ;;  %p1086_p2 = pneg %p1085_p1 }
  0x2d   : > { %504 = vmatpush.bf16.msra.mxu3 %v941_v55  ;;  %690 = vmatpush.bf16.msrb.mxu1 %v951_v56 }
  0x2e   : > { %p1091_p8 = pnand %p1090_p7, %p1086_p2 }
  0x2f   : > { %v1121_v23 = vld [vmem:[#allocation2] sm:$0xf0]   ;;  %588 = vmatpush.bf16.msra.mxu0 %v933_v61 }
  0x30   : > { %v275_v22 = vld [vmem:[#allocation2 + $0x4] sm:$0xff]   ;;  %v1020_v27 = vor.u32 %v1121_v23, %v1019_v20 }
  0x31   : > { %v283_v24 = vunpack.c.h.b16 %v275_v22  ;;  %v928_v25 = vld [vmem:[#allocation2 + $0x4] sm:$0xff]  ;;  %814 = vmatmul.msk.bf16.vlgmr.msra.gmra.mxu2 %vm285_vm4, %v275_v22  ;;  %505 = vmatpush.bf16.msra.mxu3 %v940_v58 }
  0x32   : > { %v313_v29 = vshrl.u32 %v1020_v27, 16  ;;  %v316_v30 = vshll.u32 %v1020_v27, 16  ;;  %v366_v34 = vshll.u32 %v928_v25, 16  ;;  %v364_v41 = vshrl.u32 %v928_v25, 16  ;;  %691 = vmatpush.bf16.msrb.mxu1 %v950_v59  ;;  %v601_v27 = vld [vmem:[#allocation2 + $0xc] sm:$0x1] }
  0x33   : > { %v310_v28 = vpack.c.b16 %v283_v24, %v283_v24  ;;  %589 = vmatpush.bf16.msra.mxu0 %v932_v0  ;;  %v1016_v59 = vld [vmem:[%s1323_s5] ss:$0 sm:$0xff] }
  0x34   : > { %v315_v35 = vrot.slane %v313_v29, 3  ;;  %v318_v36 = vrot.slane %v316_v30, 4  ;;  %v368_v42 = vrot.slane %v366_v34, 1  ;;  %v624_v30 = vunpack.c.l.b16 %v601_v27 }
  0x35   : > { %v321_v31 = vshrl.u32 %v310_v28, 16  ;;  %v324_v32 = vshll.u32 %v310_v28, 16  ;;  %506 = vmatpush.bf16.msra.mxu3 %v939_v62 }
  0x36   : > { %v319_v39 = vor.u32 %v318_v36, %v315_v35  ;;  %v369_v45 = vor.u32 %v368_v42, %v364_v41  ;;  %692 = vmatpush.bf16.msrb.mxu1 %v949_v63 }
  0x37   : > { %v323_v37 = vrot.slane %v321_v31, 3  ;;  %v326_v38 = vrot.slane %v324_v32, 4  ;;  %590 = vmatpush.bf16.msra.mxu0 %v931_v3  ;;  %v1023_v31 = vld [vmem:[#allocation2] sm:$0x8]  ;;  %v626_v32 = vpack.c.b16 %v624_v30, %v624_v30 }
  0x38   : > { %v374_v47 = vsel %vm362_vm6, %v369_v45, %v373_v46 }
  0x39   : > { %v327_v40 = vor.u32 %v326_v38, %v323_v37  ;;  %507 = vmatpush.bf16.msra.mxu3 %v938_v1  ;;  %v635_v9 = vshll.u32 %v626_v32, 16 }
  0x3a   : > { %693 = vmatpush.bf16.msrb.mxu1 %v948_v2 }
  0x3b   : > { %v328_v44 = vsel %vm311_vm5, %v319_v39, %v327_v40  ;;  %591 = vmatpush.bf16.msra.mxu0 %v930_v8  ;;  %v637_v42 = vrot.slane %v635_v9, 1 }
  0x3c   : > { %815 = vmatmul.msk.bf16.vlgmr.msra.gmra.mxu1 %vm285_vm4, %v328_v44 }
  0x3d   : > { %508 = vmatpush.bf16.msra.mxu3 %v937_v4 }
  0x3e   : > { %694 = vmatpush.bf16.msrb.mxu1 %v947_v5 }
  0x3f   : > { %592 = vmatpush.bf16.msra.mxu0 %v929_v12 }
  0x41   : > { %821 = vmatmul.msk.bf16.vlgmr.msrb.gmra.mxu2 %vm285_vm4, %v374_v47 }
  0x42   : > { %695 = vmatpush.bf16.msrb.mxu1 %v946_v11 }
  0xb4   : > { %v302_v60 = vpop.f32.mrf.mxu2 }
  0xb9   : > { %v344_v7 = vpop.f32.mrf.mxu1 }
  0xba   : > { %v345_v13 = vadd.f32 %v344_v7, %v302_v60 }
  0xbc   : > { %v304_v6 = vpop.f32.mrf.mxu2 }
  0xc1   : > { %v346_v18 = vpop.f32.mrf.mxu1 }
  0xc2   : > { %v347_v20 = vadd.f32 %v346_v18, %v304_v6 }
  0xc4   : > { %v390_v15 = vpop.f32.mrf.mxu2 }
  0xc5   : > { %v395_v16 = vadd.f32 %v390_v15, %v345_v13 }
  0xc7   : > { %v401_v17 = vadd.f32 %v1015_v14, %v395_v16 }
  0xc9   : > { %v403_v19 = vmax.f32 %v401_v17, 0.0 }
  0xcb   : > { %v405_v21 = vsel %vm1254_vm1, %v403_v19, 0.0 }
  0xcc   : > { %v407_v22 = vpack.c.bf16 %v405_v21, %v405_v21  ;;  %v392_v23 = vpop.f32.mrf.mxu2 }
  0xcd   : > { %v396_v24 = vadd.f32 %v392_v23, %v347_v20 }
  0xce   : > { %409 = vst [vmem:[#allocation2 + $0x4] sm:$0xf] %v407_v22 }
  0xcf   : > { %v402_v25 = vadd.f32 %v1015_v14, %v396_v24 }
  0xd1   : > { %v404_v26 = vmax.f32 %v402_v25, 0.0 }
  0xd3   : > { %v406_v28 = vsel %vm1258_vm2, %v404_v26, 0.0 }
  0xd4   : > { %v408_v29 = vpack.c.bf16 %v406_v28, %v406_v28 }
  0xd5   : > { %v1122_v34 = vld [vmem:[#allocation2] sm:$0xf0]  }
  0xd6   : > { %410 = vst [vmem:[#allocation2 + $0x8] sm:$0xf] %v408_v29  ;;  %v1024_v38 = vor.u32 %v1122_v34, %v1023_v31 }
  0xd8   : > { %v520_v43 = vshrl.u32 %v1024_v38, 16  ;;  %v523_v10 = vshll.u32 %v1024_v38, 16 }
  0xda   : > { %v522_v47 = vrot.slane %v520_v43, 3  ;;  %v525_v48 = vrot.slane %v523_v10, 4 }
  0xdc   : > { %v526_v52 = vor.u32 %v525_v48, %v522_v47 }
  0xdd   : > { %v412_v33 = vld [vmem:[#allocation2 + $0x4] sm:$0xff]  }
  0xde   : > { %v945_v35 = vld [vmem:[#allocation2 + $0x4] sm:$0xff]  ;;  %v450_v36 = vunpack.c.h.b16 %v412_v33  ;;  %509 = vmatmul.bf16.vlgmr.msra.gmra.mxu3 %v412_v33 }
  0xdf   : > { %v630_v37 = vshll.u32 %v945_v35, 16  ;;  %v628_v40 = vshrl.u32 %v945_v35, 16 }
  0xe0   : > { %v518_v39 = vpack.c.b16 %v450_v36, %v450_v36 }
  0xe1   : > { %v632_v41 = vrot.slane %v630_v37, 1 }
  0xe2   : > { %v528_v44 = vshrl.u32 %v518_v39, 16  ;;  %v531_v45 = vshll.u32 %v518_v39, 16 }
  0xe3   : > { %v633_v46 = vor.u32 %v632_v41, %v628_v40 }
  0xe4   : > { %v530_v49 = vrot.slane %v528_v44, 3  ;;  %v533_v50 = vrot.slane %v531_v45, 4 }
  0xe5   : > { %v638_v51 = vsel %vm362_vm6, %v633_v46, %v637_v42 }
  0xe6   : > { %696 = vmatmul.bf16.vlgmr.msrb.gmra.mxu1 %v638_v51  ;;  %v534_v53 = vor.u32 %v533_v50, %v530_v49 }
  0xe8   : > { %v535_v54 = vsel %vm311_vm5, %v526_v52, %v534_v53 }
  0xe9   : > { %593 = vmatmul.bf16.vlgmr.msra.gmra.mxu0 %v535_v54 }
 0x161   : > { %v510_v55 = vpop.f32.mrf.mxu3 }
 0x163   : > { %v697_v56 = vpop.f32.mrf.mxu1 }
 0x166   : > { %v594_v57 = vpop.f32.mrf.mxu0 }
 0x167   : > { %v595_v58 = vadd.f32 %v594_v57, %v510_v55 }
 0x169   : > { %v702_v60 = vadd.f32 %v697_v56, %v595_v58  ;;  %v512_v63 = vpop.f32.mrf.mxu3 }
 0x16b   : > { %v708_v61 = vadd.f32 %v1016_v59, %v702_v60  ;;  %v699_v2 = vpop.f32.mrf.mxu1 }
 0x16d   : > { %v710_v62 = vmax.f32 %v708_v61, 0.0 }
 0x16e   : > { %v596_v0 = vpop.f32.mrf.mxu0 }
 0x16f   : > { %712 = vst [vmem:[%s243_s29] sm:$0xff] %v710_v62  ;;  %v597_v1 = vadd.f32 %v596_v0, %v512_v63 }
 0x171   : > { %v703_v3 = vadd.f32 %v699_v2, %v597_v1 }
 0x173   : > { %v709_v4 = vadd.f32 %v1016_v59, %v703_v3 }
 0x175   : > { %v711_v5 = vmax.f32 %v709_v4, 0.0 }
 0x177   : > { %713 = vst [vmem:[%s243_s29 + $0x8] sm:$0xff] %v711_v5 }
 0x178   : > { %1094 = shalt.err (!%p1091_p8)
}
 0x179   : > { %s1144_s17 = smov 128   ;;  %s1145_s20 = smov 8  }
 0x17a   : > { %963 = dma.vmem_to_hbm [thread:$0]  (%p1222_p5), %s728_s7, 256, %s730_s8, %s715_s0, %s1144_s17, %s1144_s17, %s1145_s20  }
 0x17b PF: > { %p975_p9 = scmp.ge.s32.totalorder %s1137_s28, 2  ;;  %s744_s21 = sand.u32 1, %s1125_s25  }
 0x17c   : > { %s745_s22 = scalar_lea.sflag [#allocation7], %s744_s21 }
 0x17d   : > { %p970_p10 = pnand %p975_p9, %p1226_p6 }
 0x17f   : > { %p971_p11 = pneg %p970_p10 }
 0x181   : > { %1118 = dma.done.wait (%p971_p11), %s745_s22, 256  }
 0x182   : > { %1120 = vsyncadd (%p971_p11), %s745_s22, 4294967040  ;;  %p25_p12 = scmp.ge.s32.totalorder %s1209_s30, 4   ;;  %s1331_s25 = smov %s1129_s26 }
 0x183   : > { %s1332_s26 = smov %s1133_s27  ;;  %s1333_s27 = smov %s1220_s9 }
 0x184   : > { %s1334_s28 = smov %s1209_s30  ;;  %27 = sbr.rel (!%p25_p12) target bundleno = 10 (0xa), region = 84 }
 0x189   :  { %751 = vsyncpa [#allocation6], 1 }
 0x18a   :  { %753 = vsyncpa [#allocation6 + $0x1], 1 }
 0x18b   :  { %754 = vsyncpa [#allocation7], 1 }
 0x18c   :  { %756 = vsyncpa [#allocation7 + $0x1], 1 }

</bundles_post_ra>
